<compile_context>
chip_gen: v5e
topology: v5e:2x2
jax: 0.10.0
libtpu: 0.0.40
codegen_flags: <defaults>
</compile_context>

<pallas_src>
import functools

import jax
import jax.numpy as jnp
from jax.experimental import pallas as pl
from jax.experimental.pallas import tpu as pltpu

_LANE = 128
_EPS = 1e-5
_TM_DEFAULT = 512
_VMEM_LIMIT = 48 * 1024 * 1024


def _round_up(x, m):
    return (x + m - 1) // m * m


# ----------------------------------------------------------------------------
# Pass 1: tiled matmul + per-channel sum / sum-of-squares accumulation
# ----------------------------------------------------------------------------
def _matmul_stats_kernel(p_ref, w_ref, y_ref, sum_ref, ssq_ref):
    @pl.when(pl.program_id(0) == 0)
    def _init():
        sum_ref[...] = jnp.zeros_like(sum_ref)
        ssq_ref[...] = jnp.zeros_like(ssq_ref)

    y = jnp.dot(p_ref[...], w_ref[...], preferred_element_type=jnp.float32)
    y_ref[...] = y
    sum_ref[...] += jnp.sum(y, axis=0, keepdims=True)
    ssq_ref[...] += jnp.sum(y * y, axis=0, keepdims=True)


def matmul_with_stats(patches, w_mat, *, tm):
    """patches: (Mpad, K) bf16 (Mpad % tm == 0, K % 128 == 0),
       w_mat:   (K, Ppad) bf16 (Ppad % 128 == 0).
       Returns (y f32 (Mpad,Ppad), sum f32 (1,Ppad), sumsq f32 (1,Ppad))."""
    Mpad, K = patches.shape
    Ppad = w_mat.shape[1]
    assert Mpad % tm == 0 and K % _LANE == 0 and Ppad % _LANE == 0
    grid = (Mpad // tm,)

    return pl.pallas_call(
        _matmul_stats_kernel,
        out_shape=(
            jax.ShapeDtypeStruct((Mpad, Ppad), jnp.float32),
            jax.ShapeDtypeStruct((1, Ppad), jnp.float32),
            jax.ShapeDtypeStruct((1, Ppad), jnp.float32),
        ),
        grid=grid,
        in_specs=[
            pl.BlockSpec((tm, K), lambda i: (i, 0)),       # patches tile
            pl.BlockSpec((K, Ppad), lambda i: (0, 0)),     # weight, resident
        ],
        out_specs=(
            pl.BlockSpec((tm, Ppad), lambda i: (i, 0)),    # conv result tile
            pl.BlockSpec((1, Ppad), lambda i: (0, 0)),     # sum accumulator
            pl.BlockSpec((1, Ppad), lambda i: (0, 0)),     # sumsq accumulator
        ),
        compiler_params=pltpu.CompilerParams(
            dimension_semantics=("arbitrary",),            # stats reduce over M
            vmem_limit_bytes=_VMEM_LIMIT,
        ),
        cost_estimate=pl.CostEstimate(
            flops=2 * Mpad * K * Ppad,
            transcendentals=0,
            bytes_accessed=(Mpad * K * 2 + K * Ppad * 2 + Mpad * Ppad * 4),
        ),
    )(patches, w_mat)


# ----------------------------------------------------------------------------
# Pass 2: BN normalize (folded scale/shift) [+ normalized shortcut] [+ ReLU]
# ----------------------------------------------------------------------------
def _bn_epilogue_kernel(y_ref, scale_ref, shift_ref, *rest,
                        apply_relu, has_shortcut):
    if has_shortcut:
        sc_ref, sc_scale_ref, sc_shift_ref, o_ref = rest
    else:
        (o_ref,) = rest

    out = y_ref[...] * scale_ref[...] + shift_ref[...]
    if has_shortcut:
        out = out + (sc_ref[...].astype(jnp.float32) * sc_scale_ref[...]
                     + sc_shift_ref[...])
    if apply_relu:
        out = jnp.maximum(out, 0.0)
    o_ref[...] = out.astype(o_ref.dtype)


def bn_epilogue(y_pad, scale, shift, shortcut=None, sc_scale=None,
                sc_shift=None, *, apply_relu, out_dtype, tm):
    Mpad, Ppad = y_pad.shape
    assert Mpad % tm == 0
    grid = (Mpad // tm,)
    has_sc = shortcut is not None

    kernel = functools.partial(_bn_epilogue_kernel,
                               apply_relu=apply_relu, has_shortcut=has_sc)
    in_specs = [
        pl.BlockSpec((tm, Ppad), lambda i: (i, 0)),
        pl.BlockSpec((1, Ppad), lambda i: (0, 0)),
        pl.BlockSpec((1, Ppad), lambda i: (0, 0)),
    ]
    args = [y_pad, scale, shift]
    if has_sc:
        in_specs += [
            pl.BlockSpec((tm, Ppad), lambda i: (i, 0)),
            pl.BlockSpec((1, Ppad), lambda i: (0, 0)),
            pl.BlockSpec((1, Ppad), lambda i: (0, 0)),
        ]
        args += [shortcut, sc_scale, sc_shift]

    return pl.pallas_call(
        kernel,
        out_shape=jax.ShapeDtypeStruct((Mpad, Ppad), out_dtype),
        grid=grid,
        in_specs=in_specs,
        out_specs=pl.BlockSpec((tm, Ppad), lambda i: (i, 0)),
        compiler_params=pltpu.CompilerParams(
            dimension_semantics=("parallel",),             # both TCs on v7x
            vmem_limit_bytes=_VMEM_LIMIT,
        ),
        cost_estimate=pl.CostEstimate(
            flops=4 * Mpad * Ppad,
            transcendentals=0,
            bytes_accessed=Mpad * Ppad * 4 * (3 if has_sc else 2),
        ),
    )(*args)


# ----------------------------------------------------------------------------
# Glue: im2col, weight packing, BN fold, parameter init, block wiring
# ----------------------------------------------------------------------------
def _im2col_3x3(x_nhwc, stride):
    """x_nhwc already zero-padded by 1 on H and W. Returns (M, 9*C), Hout, Wout."""
    N, Hp, Wp, C = x_nhwc.shape
    Hout = (Hp - 3) // stride + 1
    Wout = (Wp - 3) // stride + 1
    cols = []
    for kh in range(3):
        for kw in range(3):
            cols.append(
                x_nhwc[:, kh:kh + stride * (Hout - 1) + 1:stride,
                       kw:kw + stride * (Wout - 1) + 1:stride, :])
    patches = jnp.concatenate(cols, axis=-1)               # (N, Hout, Wout, 9*C)
    return patches.reshape(N * Hout * Wout, 9 * C), Hout, Wout


def _conv_w_to_mat_pad_k(w, k_pad, p_pad):
    """(Cout,Cin,KH,KW) -> (k_pad, p_pad); K padding appended after KH*KW*Cin."""
    cout, cin, kh, kw = w.shape
    m = jnp.transpose(w, (2, 3, 1, 0)).reshape(kh * kw * cin, cout)
    return jnp.pad(m, ((0, k_pad - kh * kw * cin), (0, p_pad - cout)))


def _conv_w_to_mat_pad_cin(w, cin_pad, p_pad):
    """Per-tap Cin padding (activation stored channel-padded), then flatten."""
    cout, cin, kh, kw = w.shape
    w = jnp.pad(w, ((0, p_pad - cout), (0, cin_pad - cin), (0, 0), (0, 0)))
    return jnp.transpose(w, (2, 3, 1, 0)).reshape(kh * kw * cin_pad, p_pad)


def _pad_gb(g, b, p_pad):
    p = g.shape[1]
    return (jnp.pad(g, ((0, 0), (0, p_pad - p))),
            jnp.pad(b, ((0, 0), (0, p_pad - p))))


def _bn_fold(s, sq, m_rows, gamma, beta, eps=_EPS):
    """Batch stats (biased var) over m_rows real rows -> affine scale/shift."""
    mean = s / m_rows
    var = jnp.maximum(sq / m_rows - mean * mean, 0.0)
    inv = jax.lax.rsqrt(var + eps)
    scale = gamma * inv
    shift = beta - mean * scale
    return scale, shift


def init_basic_block_params(key, in_planes, planes, stride, expansion=1):
    k1, k2, k3 = jax.random.split(key, 3)
    params = {
        "w1": jax.random.normal(k1, (planes, in_planes, 3, 3), jnp.float32) * 0.05,
        "g1": jnp.ones((1, planes), jnp.float32),
        "b1": jnp.zeros((1, planes), jnp.float32),
        "w2": jax.random.normal(k2, (planes, planes, 3, 3), jnp.float32) * 0.05,
        "g2": jnp.ones((1, planes), jnp.float32),
        "b2": jnp.zeros((1, planes), jnp.float32),
    }
    if stride != 1 or in_planes != expansion * planes:
        params["wsc"] = jax.random.normal(
            k3, (expansion * planes, in_planes, 1, 1), jnp.float32) * 0.05
        params["gsc"] = jnp.ones((1, expansion * planes), jnp.float32)
        params["bsc"] = jnp.zeros((1, expansion * planes), jnp.float32)
    return params


def basic_block_forward(x_nchw, params, in_planes, planes, stride,
                        expansion=1, tm=_TM_DEFAULT):
    # NCHW (PyTorch) -> NHWC (kernel layout); kept NHWC internally.
    x = jnp.transpose(x_nchw, (0, 2, 3, 1)).astype(jnp.float32)
    N, H, W, Cin = x.shape
    Pout = expansion * planes
    Ppad = _round_up(Pout, _LANE)

    H1 = (H + 2 - 3) // stride + 1
    W1 = (W + 2 - 3) // stride + 1
    M = N * H1 * W1
    tm_eff = min(tm, _round_up(M, 8))
    Mpad = _round_up(M, tm_eff)

    # --- conv1 (3x3, stride) + bn1 + relu ------------------------------------
    xp = jnp.pad(x, ((0, 0), (1, 1), (1, 1), (0, 0)))
    p1, h1, w1 = _im2col_3x3(xp, stride)
    K1 = _round_up(p1.shape[1], _LANE)
    p1 = jnp.pad(p1.astype(jnp.bfloat16),
                 ((0, Mpad - M), (0, K1 - p1.shape[1])))
    w1m = _conv_w_to_mat_pad_k(params["w1"], K1, Ppad).astype(jnp.bfloat16)
    y1, s1, q1 = matmul_with_stats(p1, w1m, tm=tm_eff)
    g1, b1 = _pad_gb(params["g1"], params["b1"], Ppad)
    scale1, shift1 = _bn_fold(s1, q1, M, g1, b1)
    out1 = bn_epilogue(y1, scale1, shift1, apply_relu=True,
                       out_dtype=jnp.bfloat16, tm=tm_eff)      # (Mpad, Ppad)

    # --- shortcut (BN of projection is folded into conv2's epilogue) ---------
    if stride != 1 or in_planes != Pout:
        xs = x[:, ::stride, ::stride, :].reshape(M, Cin)
        Ksc = _round_up(Cin, _LANE)
        xs = jnp.pad(xs.astype(jnp.bfloat16), ((0, Mpad - M), (0, Ksc - Cin)))
        wsc = _conv_w_to_mat_pad_k(params["wsc"], Ksc, Ppad).astype(jnp.bfloat16)
        sc, ssc, qsc = matmul_with_stats(xs, wsc, tm=tm_eff)   # raw 1x1 result
        gsc, bsc = _pad_gb(params["gsc"], params["bsc"], Ppad)
        sc_scale, sc_shift = _bn_fold(ssc, qsc, M, gsc, bsc)
    else:
        sc = jnp.pad(x.reshape(M, Cin), ((0, Mpad - M), (0, Ppad - Cin)))
        sc_scale = jnp.ones((1, Ppad), jnp.float32)
        sc_shift = jnp.zeros((1, Ppad), jnp.float32)

    # --- conv2 (3x3, stride 1) + bn2 + shortcut add + relu (fused epilogue) --
    out1_img = out1[:M].reshape(N, H1, W1, Ppad)
    out1p = jnp.pad(out1_img, ((0, 0), (1, 1), (1, 1), (0, 0)))
    p2, _, _ = _im2col_3x3(out1p, 1)                           # K2 = 9*Ppad
    p2 = jnp.pad(p2, ((0, Mpad - M), (0, 0)))
    w2m = _conv_w_to_mat_pad_cin(params["w2"], Ppad, Ppad).astype(jnp.bfloat16)
    y2, s2, q2 = matmul_with_stats(p2, w2m, tm=tm_eff)
    g2, b2 = _pad_gb(params["g2"], params["b2"], Ppad)
    scale2, shift2 = _bn_fold(s2, q2, M, g2, b2)
    out = bn_epilogue(y2, scale2, shift2,
                      shortcut=sc, sc_scale=sc_scale, sc_shift=sc_shift,
                      apply_relu=True, out_dtype=jnp.float32, tm=tm_eff)

    out = out[:M, :Pout].reshape(N, H1, W1, Pout)
    return jnp.transpose(out, (0, 3, 1, 2))                    # back to NCHW


# ----------------------------------------------------------------------------
if __name__ == "__main__":
    key = jax.random.PRNGKey(0)
    kx, kp = jax.random.split(key)

    # Small shapes consistent with BasicBlock(in_planes=4, planes=8, stride=2)
    N, in_planes, H, W = 2, 4, 16, 16
    planes, stride = 8, 2

    x = jax.random.normal(kx, (N, in_planes, H, W), jnp.float32)
    params = init_basic_block_params(kp, in_planes, planes, stride)

    out = basic_block_forward(x, params, in_planes, planes, stride)
    out = jax.block_until_ready(out)

    assert out.shape == (N, planes, H // stride, W // stride), out.shape
    assert bool(jnp.all(jnp.isfinite(out)))
    assert bool(jnp.all(out >= 0.0))  # final ReLU

    print("KERNEL_OK")
</pallas_src>

<mosaic_0001>
module attributes {stable_mosaic.version = 11 : i64} {
  func.func @_matmul_stats_kernel(%arg0: i32, %arg1: memref<128x128xbf16, #tpu.memory_space<vmem>>, %arg2: memref<128x128xbf16, #tpu.memory_space<vmem>>, %arg3: memref<128x128xf32, #tpu.memory_space<vmem>>, %arg4: memref<1x128xf32, #tpu.memory_space<vmem>>, %arg5: memref<1x128xf32, #tpu.memory_space<vmem>>) attributes {dimension_semantics = [#tpu.dimension_semantics<arbitrary>], iteration_bounds = array<i64: 1>, scalar_prefetch = 0 : i64, scratch_operands = 0 : i64, tpu.core_type = #tpu.core_type<tc>, window_params = [{transform_indices = @transform_0, window_bounds = array<i64: 128, 128>}, {pipeline_mode = #tpu.pipeline_mode<synchronous>, transform_indices = @transform_1, window_bounds = array<i64: 128, 128>}, {transform_indices = @transform_2, window_bounds = array<i64: 128, 128>}, {pipeline_mode = #tpu.pipeline_mode<synchronous>, transform_indices = @transform_3, window_bounds = array<i64: 1, 128>}, {pipeline_mode = #tpu.pipeline_mode<synchronous>, transform_indices = @transform_4, window_bounds = array<i64: 1, 128>}]} {
    %c0_i32 = arith.constant 0 : i32
    %0 = arith.cmpi eq, %arg0, %c0_i32 : i32
    %1 = arith.extui %0 : i1 to i32
    %c0_i32_0 = arith.constant 0 : i32
    %2 = arith.cmpi ne, %1, %c0_i32_0 : i32
    scf.if %2 {
      %cst_16 = arith.constant 0.000000e+00 : f32
      %18 = vector.broadcast %cst_16 : f32 to vector<1x128xf32>
      %c0_17 = arith.constant 0 : index
      %c0_18 = arith.constant 0 : index
      %19 = vector.load %arg4[%c0_17, %c0_18] : memref<1x128xf32, #tpu.memory_space<vmem>>, vector<1x128xf32>
      tpu.vector_store %arg4[%c0_17, %c0_18], %18 {strides = array<i32>} : memref<1x128xf32, #tpu.memory_space<vmem>>, vector<1x128xf32>,
      %cst_19 = arith.constant 0.000000e+00 : f32
      %20 = vector.broadcast %cst_19 : f32 to vector<1x128xf32>
      %c0_20 = arith.constant 0 : index
      %c0_21 = arith.constant 0 : index
      %21 = vector.load %arg5[%c0_20, %c0_21] : memref<1x128xf32, #tpu.memory_space<vmem>>, vector<1x128xf32>
      tpu.vector_store %arg5[%c0_20, %c0_21], %20 {strides = array<i32>} : memref<1x128xf32, #tpu.memory_space<vmem>>, vector<1x128xf32>,
    } else {
    }
    %c0 = arith.constant 0 : index
    %c0_1 = arith.constant 0 : index
    %3 = vector.load %arg1[%c0, %c0_1] : memref<128x128xbf16, #tpu.memory_space<vmem>>, vector<128x128xbf16>
    %c0_2 = arith.constant 0 : index
    %c0_3 = arith.constant 0 : index
    %4 = vector.load %arg2[%c0_2, %c0_3] : memref<128x128xbf16, #tpu.memory_space<vmem>>, vector<128x128xbf16>
    %cst = arith.constant dense<0.000000e+00> : vector<128x128xf32>
    %5 = tpu.matmul %3, %4, %cst {dimension_numbers = #tpu.dot_dimension_numbers<[1], [0], [0], [1], [0, 0, 1, 1], [], []>} : vector<128x128xbf16>, vector<128x128xbf16>, vector<128x128xf32> -> vector<128x128xf32>
    %c0_4 = arith.constant 0 : index
    %c0_5 = arith.constant 0 : index
    %6 = vector.load %arg3[%c0_4, %c0_5] : memref<128x128xf32, #tpu.memory_space<vmem>>, vector<128x128xf32>
    tpu.vector_store %arg3[%c0_4, %c0_5], %5 {strides = array<i32>} : memref<128x128xf32, #tpu.memory_space<vmem>>, vector<128x128xf32>,
    %c0_6 = arith.constant 0 : index
    %c0_7 = arith.constant 0 : index
    %7 = vector.load %arg4[%c0_6, %c0_7] : memref<1x128xf32, #tpu.memory_space<vmem>>, vector<1x128xf32>
    %cst_8 = arith.constant dense<0.000000e+00> : vector<128xf32>
    %8 = vector.multi_reduction <add>, %5, %cst_8 [0] : vector<128x128xf32> to vector<128xf32>
    %9 = vector.shape_cast %8 : vector<128xf32> to vector<1x128xf32>
    %10 = arith.addf %7, %9 : vector<1x128xf32>
    %c0_9 = arith.constant 0 : index
    %c0_10 = arith.constant 0 : index
    %11 = vector.load %arg4[%c0_9, %c0_10] : memref<1x128xf32, #tpu.memory_space<vmem>>, vector<1x128xf32>
    tpu.vector_store %arg4[%c0_9, %c0_10], %10 {strides = array<i32>} : memref<1x128xf32, #tpu.memory_space<vmem>>, vector<1x128xf32>,
    %c0_11 = arith.constant 0 : index
    %c0_12 = arith.constant 0 : index
    %12 = vector.load %arg5[%c0_11, %c0_12] : memref<1x128xf32, #tpu.memory_space<vmem>>, vector<1x128xf32>
    %13 = arith.mulf %5, %5 : vector<128x128xf32>
    %cst_13 = arith.constant dense<0.000000e+00> : vector<128xf32>
    %14 = vector.multi_reduction <add>, %13, %cst_13 [0] : vector<128x128xf32> to vector<128xf32>
    %15 = vector.shape_cast %14 : vector<128xf32> to vector<1x128xf32>
    %16 = arith.addf %12, %15 : vector<1x128xf32>
    %c0_14 = arith.constant 0 : index
    %c0_15 = arith.constant 0 : index
    %17 = vector.load %arg5[%c0_14, %c0_15] : memref<1x128xf32, #tpu.memory_space<vmem>>, vector<1x128xf32>
    tpu.vector_store %arg5[%c0_14, %c0_15], %16 {strides = array<i32>} : memref<1x128xf32, #tpu.memory_space<vmem>>, vector<1x128xf32>,
    return
  }
  func.func @transform_0(%arg0: i32) -> (i32, i32) {
    %c0_i32 = arith.constant 0 : i32
    %c0_i32_0 = arith.constant 0 : i32
    return %arg0, %c0_i32 : i32, i32
  }
  func.func @transform_1(%arg0: i32) -> (i32, i32) {
    %c0_i32 = arith.constant 0 : i32
    %c0_i32_0 = arith.constant 0 : i32
    %c0_i32_1 = arith.constant 0 : i32
    return %c0_i32, %c0_i32_0 : i32, i32
  }
  func.func @transform_2(%arg0: i32) -> (i32, i32) {
    %c0_i32 = arith.constant 0 : i32
    %c0_i32_0 = arith.constant 0 : i32
    return %arg0, %c0_i32 : i32, i32
  }
  func.func @transform_3(%arg0: i32) -> (i32, i32) {
    %c0_i32 = arith.constant 0 : i32
    %c0_i32_0 = arith.constant 0 : i32
    %c0_i32_1 = arith.constant 0 : i32
    return %c0_i32, %c0_i32_0 : i32, i32
  }
  func.func @transform_4(%arg0: i32) -> (i32, i32) {
    %c0_i32 = arith.constant 0 : i32
    %c0_i32_0 = arith.constant 0 : i32
    %c0_i32_1 = arith.constant 0 : i32
    return %c0_i32, %c0_i32_0 : i32, i32
  }
}

</mosaic_0001>

<bundles_post_ra>
// kernel: tpu_custom_call.1
= control target key start
LH: loop header
LB: loop body
LE: loop exit
PB: predicated region body
PF: predicated region fallthrough
CT: control target
= control target key end

     0   :  { %10 = vsyncpa [#allocation3], 0  ;;  %s666_s0 = inlined_call_operand.hbm [shape: bf16[128,128], index: 0, kind: input, shape index: {}]   ;;  %s667_s1 = inlined_call_operand.hbm [shape: bf16[128,128], index: 1, kind: input, shape index: {}]   ;;  %s668_s2 = inlined_call_operand.hbm [shape: f32[128,128], index: 2, kind: output, shape index: {0}]   ;;  %s669_s3 = inlined_call_operand.hbm [shape: f32[1,128], index: 3, kind: output, shape index: {1}]   ;;  %s670_s4 = inlined_call_operand.hbm [shape: f32[1,128], index: 4, kind: output, shape index: {2}]  }
   0x1   :  { %11 = vsyncpa [#allocation6], 0 }
   0x2   :  { %12 = vsyncpa [#allocation4], 0 }
   0x3   :  { %13 = vsyncpa [#allocation9], 0  ;;  %s18_s17 = sshll.u32 %s666_s0, 4  ;;  %s604_s18 = smov [#allocation2]   ;;  %s19_s17 = int_to_ptr.hbm [resolvable:$true] %s18_s17 }
   0x4   :  { %s20_s19 = sshll.u32 %s604_s18, 4  ;;  %s31_s22 = sshll.u32 %s667_s1, 4  ;;  %s21_s19 = int_to_ptr.vmem [resolvable:$true] %s20_s19  ;;  %s32_s22 = int_to_ptr.hbm [resolvable:$true] %s31_s22 }
   0x5   :  { %s605_s23 = smov 64   ;;  %s606_s24 = smov 4  }
   0x6   :  { %26 = dma.hbm_to_vmem [thread:$0]  %s19_s17, 1024, %s21_s19, [#allocation3], %s605_s23, %s605_s23, %s606_s24  }
   0x7   :  { %s607_s25 = smov [#allocation5]  }
   0x8   :  { %s33_s26 = sshll.u32 %s607_s25, 4  ;;  %s34_s26 = int_to_ptr.vmem [resolvable:$true] %s33_s26 }
   0x9   :  { %39 = dma.hbm_to_vmem [thread:$0]  %s32_s22, 1024, %s34_s26, [#allocation6], %s605_s23, %s605_s23, %s606_s24  }
   0xa   :  { %596 = dma.done.wait [#allocation3], 1024  }
   0xb   :  { %597 = vsyncadd [#allocation3], 4294966272 }
   0xc   :  { %598 = dma.done.wait [#allocation6], 1024  }
   0xd   :  { %599 = vsyncadd [#allocation6], 4294966272  ;;  %v441_v0 = vld [vmem:[#allocation5 + $0x38] sm:$0xff]  ;;  %v440_v1 = vld [vmem:[#allocation5 + $0x30] sm:$0xff]  ;;  %s608_s0 = smov [#allocation7]   ;;  %s317_s29 = sshll.u32 %s668_s2, 4  ;;  %s318_s29 = int_to_ptr.hbm [resolvable:$true] %s317_s29 }
   0xe   :  { %182 = vmatpush.bf16.msra.mxu0 %v441_v0  ;;  %442 = vmatpush.bf16.msra.mxu1 %v441_v0  ;;  %v439_v2 = vld [vmem:[#allocation5 + $0x28] sm:$0xff]  ;;  %v438_v3 = vld [vmem:[#allocation5 + $0x20] sm:$0xff]  ;;  %v437_v4 = vld [vmem:[#allocation5 + $0x18] sm:$0xff]  ;;  %s315_s1 = sshll.u32 %s608_s0, 4  ;;  %v609_v42 = vmov 0.0   ;;  %s610_s30 = smov 128   ;;  %s316_s1 = int_to_ptr.vmem [resolvable:$true] %s315_s1 }
   0xf   :  { %443 = vmatpush.bf16.msra.mxu2 %v441_v0  ;;  %444 = vmatpush.bf16.msra.mxu3 %v441_v0  ;;  %v436_v5 = vld [vmem:[#allocation5 + $0x10] sm:$0xff]  ;;  %v435_v6 = vld [vmem:[#allocation5 + $0x8] sm:$0xff]  ;;  %v434_v7 = vld [vmem:[#allocation5] sm:$0xff]  ;;  %52 = vst [vmem:[#allocation8] sm:$0x1] %v609_v42  ;;  %s611_s2 = smov 8  }
  0x10   :  { %v426_v8 = vld [vmem:[#allocation2] sm:$0xff]  ;;  %v428_v9 = vld [vmem:[#allocation2 + $0x10] sm:$0xff]  ;;  %v427_v12 = vld [vmem:[#allocation2 + $0x8] sm:$0xff]  ;;  %53 = vst [vmem:[#allocation10] sm:$0x1] %v609_v42  ;;  %s612_s5 = smov [#allocation8]  }
  0x11   :  { %v430_v10 = vld [vmem:[#allocation2 + $0x20] sm:$0xff]  ;;  %v432_v11 = vld [vmem:[#allocation2 + $0x30] sm:$0xff]  ;;  %v429_v13 = vld [vmem:[#allocation2 + $0x18] sm:$0xff]  ;;  %s329_s6 = sshll.u32 %s612_s5, 4  ;;  %s331_s9 = sshll.u32 %s669_s3, 4  ;;  %s330_s6 = int_to_ptr.vmem [resolvable:$true] %s329_s6  ;;  %s332_s9 = int_to_ptr.hbm [resolvable:$true] %s331_s9 }
  0x12   :  { %183 = vmatpush.bf16.msra.mxu0 %v440_v1  ;;  %445 = vmatpush.bf16.msra.mxu1 %v440_v1  ;;  %v431_v14 = vld [vmem:[#allocation2 + $0x28] sm:$0xff]  ;;  %v433_v15 = vld [vmem:[#allocation2 + $0x38] sm:$0xff]  ;;  %s613_s10 = smov [#allocation10]   ;;  %s342_s14 = sshll.u32 %s670_s4, 4  ;;  %s343_s14 = int_to_ptr.hbm [resolvable:$true] %s342_s14 }
  0x13   :  { %446 = vmatpush.bf16.msra.mxu2 %v440_v1  ;;  %447 = vmatpush.bf16.msra.mxu3 %v440_v1  ;;  %s340_s11 = sshll.u32 %s613_s10, 4  ;;  %s341_s11 = int_to_ptr.vmem [resolvable:$true] %s340_s11 }
  0x16   :  { %184 = vmatpush.bf16.msra.mxu0 %v439_v2  ;;  %448 = vmatpush.bf16.msra.mxu1 %v439_v2 }
  0x17   :  { %449 = vmatpush.bf16.msra.mxu2 %v439_v2  ;;  %450 = vmatpush.bf16.msra.mxu3 %v439_v2 }
  0x1a   :  { %185 = vmatpush.bf16.msra.mxu0 %v438_v3  ;;  %451 = vmatpush.bf16.msra.mxu1 %v438_v3 }
  0x1b   :  { %452 = vmatpush.bf16.msra.mxu2 %v438_v3  ;;  %453 = vmatpush.bf16.msra.mxu3 %v438_v3 }
  0x1e   :  { %186 = vmatpush.bf16.msra.mxu0 %v437_v4  ;;  %454 = vmatpush.bf16.msra.mxu1 %v437_v4 }
  0x1f   :  { %455 = vmatpush.bf16.msra.mxu2 %v437_v4  ;;  %456 = vmatpush.bf16.msra.mxu3 %v437_v4 }
  0x22   :  { %187 = vmatpush.bf16.msra.mxu0 %v436_v5  ;;  %457 = vmatpush.bf16.msra.mxu1 %v436_v5 }
  0x23   :  { %458 = vmatpush.bf16.msra.mxu2 %v436_v5  ;;  %459 = vmatpush.bf16.msra.mxu3 %v436_v5 }
  0x26   :  { %188 = vmatpush.bf16.msra.mxu0 %v435_v6  ;;  %460 = vmatpush.bf16.msra.mxu1 %v435_v6 }
  0x27   :  { %461 = vmatpush.bf16.msra.mxu2 %v435_v6  ;;  %462 = vmatpush.bf16.msra.mxu3 %v435_v6 }
  0x2a   :  { %189 = vmatpush.bf16.msra.mxu0 %v434_v7  ;;  %463 = vmatpush.bf16.msra.mxu1 %v434_v7 }
  0x2b   :  { %464 = vmatpush.bf16.msra.mxu2 %v434_v7  ;;  %465 = vmatpush.bf16.msra.mxu3 %v434_v7 }
  0x2d   :  { %190 = vmatmul.bf16.vlgmr.msra.gmra.mxu0 %v426_v8  ;;  %200 = vmatmul.bf16.vlgmr.msra.gmra.mxu1 %v428_v9 }
  0x2e   :  { %210 = vmatmul.bf16.vlgmr.msra.gmra.mxu2 %v430_v10  ;;  %220 = vmatmul.bf16.vlgmr.msra.gmra.mxu3 %v432_v11 }
  0x3d   :  { %195 = vmatmul.bf16.gmra.mxu0 %v427_v12  ;;  %205 = vmatmul.bf16.gmra.mxu1 %v429_v13 }
  0x3e   :  { %215 = vmatmul.bf16.gmra.mxu2 %v431_v14  ;;  %225 = vmatmul.bf16.gmra.mxu3 %v433_v15 }
  0xaa   :  { %v191_v16 = vpop.f32.mrf.mxu0  ;;  %v201_v17 = vpop.f32.mrf.mxu1 }
  0xab   :  { %231 = vst [vmem:[#allocation7] sm:$0xff] %v191_v16  ;;  %v272_v27 = vmul.f32 %v191_v16, %v191_v16  ;;  %v276_v39 = vmul.f32 %v201_v17, %v201_v17 }
  0xac   :  { %235 = vst [vmem:[#allocation7 + $0x20] sm:$0xff] %v201_v17 }
  0xb1   :  { %v211_v18 = vpop.f32.mrf.mxu2  ;;  %v645_v19 = vpop.f32.mrf.mxu3 }
  0xb2   :  { %v193_v20 = vpop.f32.mrf.mxu0  ;;  %v203_v21 = vpop.f32.mrf.mxu1  ;;  %239 = vst [vmem:[#allocation7 + $0x40] sm:$0xff] %v211_v18  ;;  %v280_v54 = vmul.f32 %v211_v18, %v211_v18  ;;  %v284_v2 = vmul.f32 %v645_v19, %v645_v19 }
  0xb3   :  { %232 = vst [vmem:[#allocation7 + $0x8] sm:$0xff] %v193_v20  ;;  %v273_v26 = vmul.f32 %v193_v20, %v193_v20  ;;  %v248_v28 = vadd.f32 %v193_v20, %v191_v16  ;;  %v277_v43 = vmul.f32 %v203_v21, %v203_v21 }
  0xb4   :  { %236 = vst [vmem:[#allocation7 + $0x28] sm:$0xff] %v203_v21 }
  0xb5   :  { %243 = vst [vmem:[#allocation7 + $0x60] sm:$0xff] %v645_v19  ;;  %v288_v30 = vadd.f32 %v273_v26, %v272_v27  ;;  %v271_v27 = vld [vmem:[#allocation10] sm:$0x1] }
  0xb9   :  { %v213_v22 = vpop.f32.mrf.mxu2  ;;  %v648_v23 = vpop.f32.mrf.mxu3 }
  0xba   :  { %v196_v24 = vpop.f32.mrf.mxu0  ;;  %v206_v25 = vpop.f32.mrf.mxu1  ;;  %240 = vst [vmem:[#allocation7 + $0x48] sm:$0xff] %v213_v22  ;;  %v281_v57 = vmul.f32 %v213_v22, %v213_v22  ;;  %v285_v5 = vmul.f32 %v648_v23, %v648_v23 }
  0xbb   :  { %233 = vst [vmem:[#allocation7 + $0x10] sm:$0xff] %v196_v24  ;;  %v274_v29 = vmul.f32 %v196_v24, %v196_v24  ;;  %v249_v31 = vadd.f32 %v248_v28, %v196_v24  ;;  %v278_v46 = vmul.f32 %v206_v25, %v206_v25 }
  0xbc   :  { %237 = vst [vmem:[#allocation7 + $0x30] sm:$0xff] %v206_v25 }
  0xbd   :  { %244 = vst [vmem:[#allocation7 + $0x68] sm:$0xff] %v648_v23  ;;  %v289_v36 = vadd.f32 %v288_v30, %v274_v29 }
  0xc1   :  { %v216_v32 = vpop.f32.mrf.mxu2  ;;  %v226_v33 = vpop.f32.mrf.mxu3 }
  0xc2   :  { %v198_v34 = vpop.f32.mrf.mxu0  ;;  %v208_v35 = vpop.f32.mrf.mxu1  ;;  %241 = vst [vmem:[#allocation7 + $0x50] sm:$0xff] %v216_v32  ;;  %v282_v61 = vmul.f32 %v216_v32, %v216_v32  ;;  %v286_v9 = vmul.f32 %v226_v33, %v226_v33 }
  0xc3   :  { %234 = vst [vmem:[#allocation7 + $0x18] sm:$0xff] %v198_v34  ;;  %v250_v37 = vadd.f32 %v249_v31, %v198_v34  ;;  %v275_v38 = vmul.f32 %v198_v34, %v198_v34  ;;  %v279_v52 = vmul.f32 %v208_v35, %v208_v35 }
  0xc4   :  { %238 = vst [vmem:[#allocation7 + $0x38] sm:$0xff] %v208_v35 }
  0xc5   :  { %v251_v40 = vadd.f32 %v250_v37, %v201_v17  ;;  %v290_v41 = vadd.f32 %v289_v36, %v275_v38  ;;  %245 = vst [vmem:[#allocation7 + $0x70] sm:$0xff] %v226_v33 }
  0xc7   :  { %v291_v44 = vadd.f32 %v290_v41, %v276_v39  ;;  %v252_v45 = vadd.f32 %v251_v40, %v203_v21 }
  0xc9   :  { %v253_v47 = vadd.f32 %v252_v45, %v206_v25  ;;  %v292_v48 = vadd.f32 %v291_v44, %v277_v43  ;;  %v218_v49 = vpop.f32.mrf.mxu2  ;;  %v228_v50 = vpop.f32.mrf.mxu3  ;;  %v247_v25 = vld [vmem:[#allocation8] sm:$0x1] }
  0xca   :  { %242 = vst [vmem:[#allocation7 + $0x58] sm:$0xff] %v218_v49  ;;  %v283_v1 = vmul.f32 %v218_v49, %v218_v49  ;;  %v287_v13 = vmul.f32 %v228_v50, %v228_v50 }
  0xcb   :  { %v254_v51 = vadd.f32 %v253_v47, %v208_v35  ;;  %v293_v53 = vadd.f32 %v292_v48, %v278_v46  ;;  %246 = vst [vmem:[#allocation7 + $0x78] sm:$0xff] %v228_v50 }
  0xcc   :  { %323 = dma.vmem_to_hbm [thread:$0]  %s316_s1, 2048, %s318_s29, [#allocation4], %s610_s30, %s610_s30, %s611_s2  }
  0xcd   :  { %v255_v55 = vadd.f32 %v254_v51, %v211_v18  ;;  %v294_v56 = vadd.f32 %v293_v53, %v279_v52 }
  0xcf   :  { %v295_v58 = vadd.f32 %v294_v56, %v280_v54  ;;  %v256_v59 = vadd.f32 %v255_v55, %v213_v22 }
  0xd1   :  { %v257_v60 = vadd.f32 %v256_v59, %v216_v32  ;;  %v296_v62 = vadd.f32 %v295_v58, %v281_v57 }
  0xd3   :  { %v297_v63 = vadd.f32 %v296_v62, %v282_v61  ;;  %v258_v0 = vadd.f32 %v257_v60, %v218_v49 }
  0xd5   :  { %v259_v3 = vadd.f32 %v258_v0, %v645_v19  ;;  %v298_v4 = vadd.f32 %v297_v63, %v283_v1 }
  0xd7   :  { %v299_v6 = vadd.f32 %v298_v4, %v284_v2  ;;  %v260_v7 = vadd.f32 %v259_v3, %v648_v23 }
  0xd9   :  { %v261_v8 = vadd.f32 %v260_v7, %v226_v33  ;;  %v300_v10 = vadd.f32 %v299_v6, %v285_v5 }
  0xdb   :  { %v301_v11 = vadd.f32 %v300_v10, %v286_v9  ;;  %v262_v12 = vadd.f32 %v261_v8, %v228_v50 }
  0xdd   :  { %v263_v14 = vrot.slane %v262_v12, 4  ;;  %v302_v15 = vadd.f32 %v301_v11, %v287_v13 }
  0xdf   :  { %v264_v16 = vadd.f32 %v263_v14, %v262_v12  ;;  %v303_v17 = vrot.slane %v302_v15, 4 }
  0xe1   :  { %v265_v18 = vrot.slane %v264_v16, 2  ;;  %v304_v20 = vadd.f32 %v303_v17, %v302_v15 }
  0xe3   :  { %v266_v19 = vadd.f32 %v265_v18, %v264_v16  ;;  %v305_v21 = vrot.slane %v304_v20, 2 }
  0xe5   :  { %v267_v22 = vrot.slane %v266_v19, 1  ;;  %v306_v24 = vadd.f32 %v305_v21, %v304_v20 }
  0xe7   :  { %v268_v23 = vadd.f32 %v267_v22, %v266_v19  ;;  %v307_v26 = vrot.slane %v306_v24, 1 }
  0xe9   :  { %v308_v28 = vadd.f32 %v307_v26, %v306_v24  ;;  %v269_v29 = vadd.f32 %v268_v23, %v247_v25 }
  0xeb   :  { %270 = vst [vmem:[#allocation8] sm:$0x1] %v269_v29  ;;  %v309_v30 = vadd.f32 %v308_v28, %v271_v27 }
  0xec   :  { %334 = dma.vmem_to_hbm [thread:$0]  %s330_s6, 16, %s332_s9, [#allocation9]  }
  0xed   :  { %310 = vst [vmem:[#allocation10] sm:$0x1] %v309_v30 }
  0xee   :  { %345 = dma.vmem_to_hbm [thread:$0]  %s341_s11, 16, %s343_s14, [#allocation9]  }
  0xef   :  { %600 = dma.done.wait [#allocation4], 2048  }
  0xf0   :  { %601 = vsyncadd [#allocation4], 4294965248 }
  0xf1   :  { %602 = dma.done.wait [#allocation9], 32  }
  0xf2   :  { %603 = vsyncadd [#allocation9], 4294967264 }
  0xf3   :  { %358 = vsyncpa [#allocation3], 1 }
  0xf4   :  { %359 = vsyncpa [#allocation6], 1 }
  0xf5   :  { %360 = vsyncpa [#allocation4], 1 }
  0xf6   :  { %361 = vsyncpa [#allocation9], 1 }

</bundles_post_ra>
